<compile_context>
chip_gen: v7x
topology: tpu7x:2x2x1
jax: 0.10.0
libtpu: 0.0.40
codegen_flags: <defaults>
</compile_context>

<pallas_src>
import functools

import jax
import jax.numpy as jnp
from jax.experimental import pallas as pl
from jax.experimental.pallas import tpu as pltpu

LANES = 128
SUBLANES = 8
ACC_ROWS = 4 * SUBLANES          # 32-row per-core accumulator slab (4 chains)
SMALL_INPUT_ELEMS = 1 << 20      # below this, a fused XLA reduction wins


def _tpu_defaults():
    """(n_cores, tile_rows) defaults per TPU generation."""
    n_cores, tile_rows = 1, 4096
    try:
        kind = jax.devices()[0].device_kind.lower().replace(" ", "")
        if "v5lite" in kind or "v5e" in kind:
            n_cores, tile_rows = 1, 2048   # stay well under 16 MiB scoped VMEM
        elif "v6" in kind:
            n_cores, tile_rows = 1, 8192   # 8 MiB blocks, fits 32 MiB default
        elif "v7" in kind or "7x" in kind:
            n_cores, tile_rows = 2, 8192   # 2 TensorCores; big blocks amortize
    except Exception:
        pass
    return n_cores, tile_rows


def _make_rmse_kernel(tile_rows, rows, blocks_per_core, n_blocks,
                      last_partial, has_oob_blocks):
    """SSE-accumulation kernel over (tile_rows, 128) blocks."""

    def accum(out_ref, dd):
        # 4 independent (8,128) accumulation chains (keeps VALU adds pipelined).
        out_ref[...] += jnp.sum(
            dd.reshape(tile_rows // ACC_ROWS, ACC_ROWS, LANES), axis=0)

    def kernel(x_ref, y_ref, out_ref):
        c = pl.program_id(0)
        i = pl.program_id(1)
        block_id = c * blocks_per_core + i

        @pl.when(i == 0)
        def _():
            out_ref[...] = jnp.zeros_like(out_ref)

        def compute_dd():
            d = x_ref[...].astype(jnp.float32) - y_ref[...].astype(jnp.float32)
            return d * d

        if last_partial:
            # Hot path: fully-valid blocks, no masking at all.
            @pl.when(block_id < n_blocks - 1)
            def _():
                accum(out_ref, compute_dd())

            # Cold path: the single partial edge block gets a row mask.  Rows
            # past `rows` are out-of-bounds garbage and must be dropped.
            # (Clamped duplicate blocks have block_id >= n_blocks: skipped.)
            @pl.when(block_id == n_blocks - 1)
            def _():
                dd = compute_dd()
                rid = block_id * tile_rows + jax.lax.broadcasted_iota(
                    jnp.int32, (tile_rows, LANES), 0)
                accum(out_ref, jnp.where(rid < rows, dd, 0.0))
        elif has_oob_blocks:
            # All real blocks are full; only skip the clamped duplicate blocks.
            @pl.when(block_id < n_blocks)
            def _():
                accum(out_ref, compute_dd())
        else:
            # Fully aligned: minimal body on every grid step.
            accum(out_ref, compute_dd())

    return kernel


def rmse_loss(x, y, *, tile_rows=None, n_cores=None, use_kernel=None):
    """sqrt(mean((x - y)^2)) over all elements (nn.MSELoss default reduction)."""
    assert x.shape == y.shape, "x and y must have the same shape"
    n_elems = x.size

    if use_kernel is None:
        use_kernel = n_elems >= SMALL_INPUT_ELEMS
    if not use_kernel:
        d = x.astype(jnp.float32) - y.astype(jnp.float32)
        return jnp.sqrt(jnp.mean(d * d))

    def_cores, def_tr = _tpu_defaults()
    if tile_rows is None:
        tile_rows = def_tr
    if n_cores is None:
        n_cores = def_cores

    xf = jnp.ravel(x)
    yf = jnp.ravel(y)

    # Lane alignment: only pad (zeros -> contribute 0 to the SSE) when the
    # element count is not a multiple of 128.  The common ML case (n % 128 == 0)
    # is completely copy-free.
    # TODO(synk): a manual-DMA (memory_space=pl.ANY) path could avoid this copy
    # for large unaligned inputs; not worth the complexity here.
    lane_pad = (-n_elems) % LANES
    if lane_pad:
        xf = jnp.pad(xf, (0, lane_pad))
        yf = jnp.pad(yf, (0, lane_pad))
    rows = (n_elems + lane_pad) // LANES

    # Tiny slabs: pad rows up to the accumulator height so block <= array.
    if rows < ACC_ROWS:
        row_pad = ACC_ROWS - rows
        xf = jnp.pad(xf, (0, row_pad * LANES))
        yf = jnp.pad(yf, (0, row_pad * LANES))
        rows += row_pad

    x2d = xf.reshape(rows, LANES)
    y2d = yf.reshape(rows, LANES)

    # Streaming tile rows: <= rows, multiple of 32 (dtype-proof, 4 acc chains).
    tr = min(int(tile_rows), rows)
    tr = max(ACC_ROWS, (tr // ACC_ROWS) * ACC_ROWS)

    n_blocks = pl.cdiv(rows, tr)
    n_cores = max(1, min(int(n_cores), n_blocks))
    blocks_per_core = pl.cdiv(n_blocks, n_cores)
    last_partial = (n_blocks * tr != rows)
    has_oob_blocks = (blocks_per_core * n_cores != n_blocks)

    kernel = _make_rmse_kernel(tr, rows, blocks_per_core, n_blocks,
                               last_partial, has_oob_blocks)

    def in_map(c, i):
        # Clamp so a core with fewer real blocks re-reads the last real block;
        # its compute is skipped inside the kernel.
        return (jnp.minimum(c * blocks_per_core + i, n_blocks - 1), 0)

    partial = pl.pallas_call(
        kernel,
        out_shape=jax.ShapeDtypeStruct((n_cores * ACC_ROWS, LANES), jnp.float32),
        grid_spec=pltpu.PrefetchScalarGridSpec(
            num_scalar_prefetch=0,
            grid=(n_cores, blocks_per_core),
            in_specs=[
                pl.BlockSpec((tr, LANES), in_map),
                pl.BlockSpec((tr, LANES), in_map),
            ],
            # Per-core resident (32, 128) f32 partial-sum slab (accumulator).
            out_specs=pl.BlockSpec((ACC_ROWS, LANES), lambda c, i: (c, 0)),
        ),
        compiler_params=pltpu.CompilerParams(
            dimension_semantics=("parallel", "arbitrary"),
        ),
    )(x2d, y2d)

    # Tiny epilogue in plain JAX: reduce the partial sums, divide, sqrt.
    return jnp.sqrt(jnp.sum(partial) / n_elems)


if __name__ == "__main__":
    key = jax.random.PRNGKey(0)
    kx, ky = jax.random.split(key)

    # Small NCHW shape consistent with typical RMSELoss usage.
    shape = (2, 4, 16, 16)
    x = jax.random.normal(kx, shape, dtype=jnp.float32)
    y = jax.random.normal(ky, shape, dtype=jnp.float32)

    # Force the Pallas kernel even at this small size (the default dispatch
    # routes <1M-element inputs to the fused-XLA fast path).
    loss = jax.block_until_ready(rmse_loss(x, y, use_kernel=True))
    ref = jnp.sqrt(jnp.mean((x - y) ** 2))
    assert jnp.allclose(loss, ref, rtol=1e-5, atol=1e-6), (loss, ref)

    # Small-input fast path (pure fused XLA reduction).
    loss_fast = jax.block_until_ready(rmse_loss(x, y))
    assert jnp.allclose(loss_fast, ref, rtol=1e-5, atol=1e-6), (loss_fast, ref)

    # Unaligned element count (exercises the lane/row zero-padding path).
    shape2 = (3, 5, 7, 11)
    x2 = jax.random.normal(kx, shape2, dtype=jnp.float32)
    y2 = jax.random.normal(ky, shape2, dtype=jnp.float32)
    loss2 = jax.block_until_ready(rmse_loss(x2, y2, use_kernel=True))
    ref2 = jnp.sqrt(jnp.mean((x2 - y2) ** 2))
    assert jnp.allclose(loss2, ref2, rtol=1e-5, atol=1e-6), (loss2, ref2)

    # Partial edge block + clamped duplicate block: rows=72, tr=32 -> 3 blocks
    # split over a forced 2-core axis (exercises both pl.when cold paths).
    shape3 = (72, 128)
    x3 = jax.random.normal(kx, shape3, dtype=jnp.float32)
    y3 = jax.random.normal(ky, shape3, dtype=jnp.float32)
    loss3 = jax.block_until_ready(
        rmse_loss(x3, y3, use_kernel=True, tile_rows=32, n_cores=2))
    ref3 = jnp.sqrt(jnp.mean((x3 - y3) ** 2))
    assert jnp.allclose(loss3, ref3, rtol=1e-5, atol=1e-6), (loss3, ref3)

    print("KERNEL_OK")
</pallas_src>

<mosaic_0001>
module attributes {stable_mosaic.version = 11 : i64} {
  func.func @kernel(%arg0: i32, %arg1: i32, %arg2: memref<32x128xf32, #tpu.memory_space<vmem>>, %arg3: memref<32x128xf32, #tpu.memory_space<vmem>>, %arg4: memref<32x128xf32, #tpu.memory_space<vmem>>) attributes {dimension_semantics = [#tpu.dimension_semantics<parallel>, #tpu.dimension_semantics<arbitrary>], iteration_bounds = array<i64: 1, 1>, scalar_prefetch = 0 : i64, scratch_operands = 0 : i64, tpu.core_type = #tpu.core_type<tc>, window_params = [{transform_indices = @transform_0, window_bounds = array<i64: 32, 128>}, {transform_indices = @transform_1, window_bounds = array<i64: 32, 128>}, {transform_indices = @transform_2, window_bounds = array<i64: 32, 128>}]} {
    %c0_i32 = arith.constant 0 : i32
    %0 = arith.cmpi eq, %arg1, %c0_i32 : i32
    %1 = arith.extui %0 : i1 to i32
    %c0_i32_0 = arith.constant 0 : i32
    %2 = arith.cmpi ne, %1, %c0_i32_0 : i32
    scf.if %2 {
      %cst_8 = arith.constant 0.000000e+00 : f32
      %12 = vector.broadcast %cst_8 : f32 to vector<32x128xf32>
      %c0_9 = arith.constant 0 : index
      %c0_10 = arith.constant 0 : index
      %13 = vector.load %arg4[%c0_9, %c0_10] : memref<32x128xf32, #tpu.memory_space<vmem>>, vector<32x128xf32>
      tpu.vector_store %arg4[%c0_9, %c0_10], %12 {strides = array<i32>} : memref<32x128xf32, #tpu.memory_space<vmem>>, vector<32x128xf32>,
    } else {
    }
    %c0 = arith.constant 0 : index
    %c0_1 = arith.constant 0 : index
    %3 = vector.load %arg2[%c0, %c0_1] : memref<32x128xf32, #tpu.memory_space<vmem>>, vector<32x128xf32>
    %c0_2 = arith.constant 0 : index
    %c0_3 = arith.constant 0 : index
    %4 = vector.load %arg3[%c0_2, %c0_3] : memref<32x128xf32, #tpu.memory_space<vmem>>, vector<32x128xf32>
    %5 = arith.subf %3, %4 : vector<32x128xf32>
    %6 = arith.mulf %5, %5 : vector<32x128xf32>
    %c0_4 = arith.constant 0 : index
    %c0_5 = arith.constant 0 : index
    %7 = vector.load %arg4[%c0_4, %c0_5] : memref<32x128xf32, #tpu.memory_space<vmem>>, vector<32x128xf32>
    %8 = vector.shape_cast %6 : vector<32x128xf32> to vector<1x32x128xf32>
    %cst = arith.constant dense<0.000000e+00> : vector<32x128xf32>
    %9 = vector.multi_reduction <add>, %8, %cst [0] : vector<1x32x128xf32> to vector<32x128xf32>
    %10 = arith.addf %7, %9 : vector<32x128xf32>
    %c0_6 = arith.constant 0 : index
    %c0_7 = arith.constant 0 : index
    %11 = vector.load %arg4[%c0_6, %c0_7] : memref<32x128xf32, #tpu.memory_space<vmem>>, vector<32x128xf32>
    tpu.vector_store %arg4[%c0_6, %c0_7], %10 {strides = array<i32>} : memref<32x128xf32, #tpu.memory_space<vmem>>, vector<32x128xf32>,
    return
  }
  func.func @transform_0(%arg0: i32, %arg1: i32) -> (i32, i32) {
    %c1_i32 = arith.constant 1 : i32
    %0 = arith.muli %arg0, %c1_i32 : i32
    %1 = arith.addi %0, %arg1 : i32
    %c0_i32 = arith.constant 0 : i32
    %2 = arith.minsi %1, %c0_i32 : i32
    %c0_i32_0 = arith.constant 0 : i32
    %c0_i32_1 = arith.constant 0 : i32
    return %2, %c0_i32_0 : i32, i32
  }
  func.func @transform_1(%arg0: i32, %arg1: i32) -> (i32, i32) {
    %c1_i32 = arith.constant 1 : i32
    %0 = arith.muli %arg0, %c1_i32 : i32
    %1 = arith.addi %0, %arg1 : i32
    %c0_i32 = arith.constant 0 : i32
    %2 = arith.minsi %1, %c0_i32 : i32
    %c0_i32_0 = arith.constant 0 : i32
    %c0_i32_1 = arith.constant 0 : i32
    return %2, %c0_i32_0 : i32, i32
  }
  func.func @transform_2(%arg0: i32, %arg1: i32) -> (i32, i32) {
    %c0_i32 = arith.constant 0 : i32
    %c0_i32_0 = arith.constant 0 : i32
    return %arg0, %c0_i32 : i32, i32
  }
}

</mosaic_0001>

<bundles_post_ra>
// kernel: tpu_custom_call.1
= control target key start
LH: loop header
LB: loop body
LE: loop exit
PB: predicated region body
PF: predicated region fallthrough
CT: control target
= control target key end

     0   :  { %7 = vsyncpa [#allocation3], 0  ;;  %s265_s0 = inlined_call_operand.hbm [shape: f32[32,128], index: 0, kind: input, shape index: {}]   ;;  %s266_s1 = inlined_call_operand.hbm [shape: f32[32,128], index: 1, kind: input, shape index: {}]   ;;  %s267_s2 = inlined_call_operand.hbm [shape: f32[32,128], index: 2, kind: output, shape index: {}]  }
   0x1   :  { %8 = vsyncpa [#allocation6], 0 }
   0x2   :  { %9 = vsyncpa [#allocation4], 0  ;;  %s200_s9 = smov [#allocation2]   ;;  %s128_s13 = scalar_lea.hbm %s265_s0, 512 }
   0x3   :  { %s21_s10 = sshll.u32 %s200_s9, 4  ;;  %p129_p0 = scmp.ne.s32.totalorder %s265_s0, %s128_s13  ;;  %s22_s10 = int_to_ptr.vmem [resolvable:$true] %s21_s10 }
   0x4   :  { %p132_p1 = scmp.lt.u32.totalorder %s128_s13, %s265_s0 }
   0x6   :  { %p134_p2 = pnand %p132_p1, %p129_p0 }
   0x8   :  { %137 = shalt.err (!%p134_p2)
}
   0x9   :  { %s138_s18 = scalar_lea.vmem %s22_s10, 512  ;;  %p143_p4 = scmp.lt.s32.totalorder %s22_s10, %s22_s10 }
   0xa   :  { %p139_p3 = scmp.ne.s32.totalorder %s22_s10, %s138_s18  ;;  %p144_p5 = scmp.lt.s32.totalorder %s138_s18, %s138_s18 }
   0xc   :  { %p145_p6 = por %p144_p5, %p143_p4 }
   0xe   :  { %p146_p7 = pnand %p145_p6, %p139_p3 }
  0x10   :  { %149 = shalt.err (!%p146_p7)
}
  0x11   :  { %s201_s19 = smov 128   ;;  %s202_s20 = smov 8  }
  0x12   :  { %27 = dma.hbm_to_vmem [thread:$0]  %s265_s0, 512, %s22_s10, [#allocation3], %s201_s19, %s201_s19, %s202_s20  }
  0x13   :  { %s203_s23 = smov [#allocation5]   ;;  %s150_s27 = scalar_lea.hbm %s266_s1, 512 }
  0x14   :  { %s39_s24 = sshll.u32 %s203_s23, 4  ;;  %p151_p8 = scmp.ne.s32.totalorder %s266_s1, %s150_s27  ;;  %s40_s24 = int_to_ptr.vmem [resolvable:$true] %s39_s24 }
  0x15   :  { %p154_p9 = scmp.lt.u32.totalorder %s150_s27, %s266_s1 }
  0x17   :  { %p156_p10 = pnand %p154_p9, %p151_p8 }
  0x19   :  { %159 = shalt.err (!%p156_p10)
}
  0x1a   :  { %s160_s4 = scalar_lea.vmem %s40_s24, 512  ;;  %p165_p12 = scmp.lt.s32.totalorder %s40_s24, %s40_s24 }
  0x1b   :  { %p161_p11 = scmp.ne.s32.totalorder %s40_s24, %s160_s4  ;;  %p166_p13 = scmp.lt.s32.totalorder %s160_s4, %s160_s4 }
  0x1d   :  { %p167_p0 = por %p166_p13, %p165_p12 }
  0x1f   :  { %p168_p1 = pnand %p167_p0, %p161_p11 }
  0x21   :  { %171 = shalt.err (!%p168_p1)
}
  0x22   :  { %45 = dma.hbm_to_vmem [thread:$0]  %s266_s1, 512, %s40_s24, [#allocation6], %s201_s19, %s201_s19, %s202_s20  }
  0x23   :  { %194 = dma.done.wait [#allocation3], 512  }
  0x24   :  { %195 = vsyncadd [#allocation3], 4294966784 }
  0x25   :  { %196 = dma.done.wait [#allocation6], 512  }
  0x26   :  { %197 = vsyncadd [#allocation6], 4294966784  ;;  %v68_v0 = vld [vmem:[#allocation2] sm:$0xff]  ;;  %v69_v2 = vld [vmem:[#allocation2 + $0x8] sm:$0xff]  ;;  %s204_s1 = smov [#allocation7]  }
  0x27   :  { %v72_v1 = vld [vmem:[#allocation5] sm:$0xff]  ;;  %v73_v4 = vld [vmem:[#allocation5 + $0x8] sm:$0xff]  ;;  %v70_v5 = vld [vmem:[#allocation2 + $0x10] sm:$0xff]  ;;  %s105_s6 = sshll.u32 %s204_s1, 4  ;;  %s106_s6 = int_to_ptr.vmem [resolvable:$true] %s105_s6 }
  0x28   :  { %v76_v3 = vsub.f32 %v68_v0, %v72_v1  ;;  %v74_v6 = vld [vmem:[#allocation5 + $0x10] sm:$0xff]  ;;  %v77_v7 = vsub.f32 %v69_v2, %v73_v4  ;;  %v71_v9 = vld [vmem:[#allocation2 + $0x18] sm:$0xff]  ;;  %s172_s7 = scalar_lea.vmem %s106_s6, 512  ;;  %p177_p3 = scmp.lt.s32.totalorder %s106_s6, %s106_s6 }
  0x29   :  { %v78_v8 = vsub.f32 %v70_v5, %v74_v6  ;;  %v75_v10 = vld [vmem:[#allocation5 + $0x18] sm:$0xff]  ;;  %p173_p2 = scmp.ne.s32.totalorder %s106_s6, %s172_s7  ;;  %p178_p4 = scmp.lt.s32.totalorder %s172_s7, %s172_s7 }
  0x2a   :  { %v80_v11 = vmul.f32 %v76_v3, %v76_v3  ;;  %v79_v12 = vsub.f32 %v71_v9, %v75_v10  ;;  %v81_v13 = vmul.f32 %v77_v7, %v77_v7 }
  0x2b   :  { %v82_v14 = vmul.f32 %v78_v8, %v78_v8  ;;  %p179_p5 = por %p178_p4, %p177_p3 }
  0x2c   :  { %v83_v15 = vmul.f32 %v79_v12, %v79_v12  ;;  %96 = vst [vmem:[#allocation7] sm:$0xff] %v80_v11  ;;  %97 = vst [vmem:[#allocation7 + $0x8] sm:$0xff] %v81_v13 }
  0x2d   :  { %98 = vst [vmem:[#allocation7 + $0x10] sm:$0xff] %v82_v14  ;;  %p180_p6 = pnand %p179_p5, %p173_p2 }
  0x2e   :  { %99 = vst [vmem:[#allocation7 + $0x18] sm:$0xff] %v83_v15 }
  0x2f   :  { %183 = shalt.err (!%p180_p6)
}
  0x30   :  { %s184_s10 = scalar_lea.hbm %s267_s2, 512 }
  0x31   :  { %p185_p7 = scmp.ne.s32.totalorder %s267_s2, %s184_s10  ;;  %p188_p8 = scmp.lt.u32.totalorder %s184_s10, %s267_s2 }
  0x33   :  { %p190_p9 = pnand %p188_p8, %p185_p7 }
  0x35   :  { %193 = shalt.err (!%p190_p9)
}
  0x36   :  { %111 = dma.vmem_to_hbm [thread:$0]  %s106_s6, 512, %s267_s2, [#allocation4], %s201_s19, %s201_s19, %s202_s20  }
  0x37   :  { %198 = dma.done.wait [#allocation4], 512  }
  0x38   :  { %199 = vsyncadd [#allocation4], 4294966784 }
  0x39   :  { %115 = vsyncpa [#allocation3], 1 }
  0x3a   :  { %116 = vsyncpa [#allocation6], 1 }
  0x3b   :  { %117 = vsyncpa [#allocation4], 1 }

</bundles_post_ra>
